<compile_context>
chip_gen: v7x
topology: tpu7x:2x2x1
jax: 0.10.0
libtpu: 0.0.40
codegen_flags: <defaults>
</compile_context>

<pallas_src>
import jax
import jax.numpy as jnp
from jax.experimental import pallas as pl
from jax.experimental.pallas import tpu as pltpu

_NUM_CORES = 2                        # v7x has 2 TCs; harmless extra outer iter on v5e/v6e.
_TARGET_TILE_BYTES = 2 * 1024 * 1024  # per-step input tile size (in input dtype bytes)
_MAX_SLAB_BYTES = 4 * 1024 * 1024     # beyond this a single (H, W) slab would need spatial tiling


def _tv_kernel(x_ref, hacc_ref, wacc_ref):
    # x_ref:    (TN, H, W)   input slab for this grid step.
    # hacc_ref: (1, H-1, W)  per-core accumulator of vertical (dx_h)^2, VMEM-resident.
    # wacc_ref: (1, H, W-1)  per-core accumulator of horizontal (dx_w)^2, VMEM-resident.
    step = pl.program_id(1)

    @pl.when(step == 0)
    def _():
        hacc_ref[...] = jnp.zeros_like(hacc_ref)
        wacc_ref[...] = jnp.zeros_like(wacc_ref)

    x = x_ref[...].astype(jnp.float32)            # (TN, H, W)
    dh = x[:, 1:, :] - x[:, :-1, :]               # (TN, H-1, W)
    dw = x[:, :, 1:] - x[:, :, :-1]               # (TN, H, W-1)
    # Reduce only along the leading (slab) axis: pure VALU adds, lane layout
    # untouched.  The expensive cross-lane reduce happens once, in the wrapper.
    hacc_ref[...] += jnp.sum(dh * dh, axis=0, keepdims=True)
    wacc_ref[...] += jnp.sum(dw * dw, axis=0, keepdims=True)


def tv_loss(x):
    """Total-variation loss, identical semantics to PyTorch TVLoss.forward.

    x: (B, C, H, W) float array (NCHW).  Returns a float32 scalar.
    """
    b, c, h, w = x.shape
    count_h = c * (h - 1) * w
    count_w = c * h * (w - 1)

    itemsize = jnp.dtype(x.dtype).itemsize
    slab_bytes = h * w * itemsize
    if h < 2 or w < 2 or slab_bytes > _MAX_SLAB_BYTES:
        # Degenerate spatial dims (PyTorch divides by zero here too), or a
        # single (H, W) slab too large for the per-step VMEM budget.
        # TODO(synk): spatially tile very large H*W slabs instead of XLA fallback.
        return tv_loss_ref(x)

    n = b * c
    # Slabs per grid step: ~_TARGET_TILE_BYTES of input per step (amortizes the
    # ~0.35us per-step overhead), capped so every core gets at least one step.
    tn = max(1, _TARGET_TILE_BYTES // slab_bytes)
    tn = min(tn, pl.cdiv(n, _NUM_CORES))
    steps = pl.cdiv(n, _NUM_CORES * tn)
    n_pad = _NUM_CORES * steps * tn

    x_flat = x.reshape(n, h, w)
    if n_pad != n:
        # Zero slabs contribute exactly zero to both sums.
        x_flat = jnp.pad(x_flat, ((0, n_pad - n), (0, 0), (0, 0)))

    cost = pl.CostEstimate(
        flops=6 * n * h * w,
        transcendentals=0,
        bytes_accessed=n_pad * h * w * itemsize
        + _NUM_CORES * ((h - 1) * w + h * (w - 1)) * 4,
    )

    hacc, wacc = pl.pallas_call(
        _tv_kernel,
        out_shape=(
            jax.ShapeDtypeStruct((_NUM_CORES, h - 1, w), jnp.float32),
            jax.ShapeDtypeStruct((_NUM_CORES, h, w - 1), jnp.float32),
        ),
        grid_spec=pltpu.PrefetchScalarGridSpec(
            num_scalar_prefetch=0,
            grid=(_NUM_CORES, steps),
            in_specs=[
                pl.BlockSpec((tn, h, w), lambda ci, si: (ci * steps + si, 0, 0)),
            ],
            out_specs=[
                pl.BlockSpec((1, h - 1, w), lambda ci, si: (ci, 0, 0)),
                pl.BlockSpec((1, h, w - 1), lambda ci, si: (ci, 0, 0)),
            ],
        ),
        compiler_params=pltpu.CompilerParams(
            dimension_semantics=("parallel", "arbitrary"),
            vmem_limit_bytes=48 * 1024 * 1024,
        ),
        cost_estimate=cost,
    )(x_flat)

    htv = jnp.sum(hacc)
    wtv = jnp.sum(wacc)
    return 2.0 * (htv / count_h + wtv / count_w) / b


def tv_loss_ref(x):
    """Pure-JAX reference mirroring the PyTorch code."""
    b, c, h, w = x.shape
    count_h = c * (h - 1) * w
    count_w = c * h * (w - 1)
    htv = jnp.sum(jnp.square(x[:, :, 1:, :] - x[:, :, : h - 1, :]))
    wtv = jnp.sum(jnp.square(x[:, :, :, 1:] - x[:, :, :, : w - 1]))
    return 2.0 * (htv / count_h + wtv / count_w) / b


if __name__ == "__main__":
    key = jax.random.PRNGKey(0)
    x = jax.random.normal(key, (2, 4, 16, 16), dtype=jnp.float32)  # NCHW

    out = jax.block_until_ready(tv_loss(x))
    ref = jax.block_until_ready(tv_loss_ref(x))

    assert out.shape == ()
    assert jnp.allclose(out, ref, rtol=1e-5, atol=1e-5), (out, ref)
    print("KERNEL_OK")
</pallas_src>

<mosaic_0001>
module attributes {stable_mosaic.version = 11 : i64} {
  func.func @_tv_kernel(%arg0: i32, %arg1: i32, %arg2: memref<4x16x16xf32, #tpu.memory_space<vmem>>, %arg3: memref<1x15x16xf32, #tpu.memory_space<vmem>>, %arg4: memref<1x16x15xf32, #tpu.memory_space<vmem>>) attributes {dimension_semantics = [#tpu.dimension_semantics<parallel>, #tpu.dimension_semantics<arbitrary>], iteration_bounds = array<i64: 2, 1>, scalar_prefetch = 0 : i64, scratch_operands = 0 : i64, tpu.core_type = #tpu.core_type<tc>, window_params = [{transform_indices = @transform_0, window_bounds = array<i64: 4, 16, 16>}, {transform_indices = @transform_1, window_bounds = array<i64: 1, 15, 16>}, {transform_indices = @transform_2, window_bounds = array<i64: 1, 16, 15>}]} {
    %c0_i32 = arith.constant 0 : i32
    %0 = arith.cmpi eq, %arg1, %c0_i32 : i32
    %1 = arith.extui %0 : i1 to i32
    %c0_i32_0 = arith.constant 0 : i32
    %2 = arith.cmpi ne, %1, %c0_i32_0 : i32
    scf.if %2 {
      %cst_16 = arith.constant 0.000000e+00 : f32
      %22 = vector.broadcast %cst_16 : f32 to vector<1x15x16xf32>
      %c0_17 = arith.constant 0 : index
      %c0_18 = arith.constant 0 : index
      %c0_19 = arith.constant 0 : index
      %23 = vector.load %arg3[%c0_17, %c0_18, %c0_19] : memref<1x15x16xf32, #tpu.memory_space<vmem>>, vector<1x15x16xf32>
      tpu.vector_store %arg3[%c0_17, %c0_18, %c0_19], %22 {strides = array<i32>} : memref<1x15x16xf32, #tpu.memory_space<vmem>>, vector<1x15x16xf32>,
      %cst_20 = arith.constant 0.000000e+00 : f32
      %24 = vector.broadcast %cst_20 : f32 to vector<1x16x15xf32>
      %c0_21 = arith.constant 0 : index
      %c0_22 = arith.constant 0 : index
      %c0_23 = arith.constant 0 : index
      %25 = vector.load %arg4[%c0_21, %c0_22, %c0_23] : memref<1x16x15xf32, #tpu.memory_space<vmem>>, vector<1x16x15xf32>
      tpu.vector_store %arg4[%c0_21, %c0_22, %c0_23], %24 {strides = array<i32>} : memref<1x16x15xf32, #tpu.memory_space<vmem>>, vector<1x16x15xf32>,
    } else {
    }
    %c0 = arith.constant 0 : index
    %c0_1 = arith.constant 0 : index
    %c0_2 = arith.constant 0 : index
    %3 = vector.load %arg2[%c0, %c0_1, %c0_2] : memref<4x16x16xf32, #tpu.memory_space<vmem>>, vector<4x16x16xf32>
    %4 = vector.extract_strided_slice %3 {offsets = [0, 1, 0], sizes = [4, 15, 16], strides = [1, 1, 1]} : vector<4x16x16xf32> to vector<4x15x16xf32>
    %5 = vector.extract_strided_slice %3 {offsets = [0, 0, 0], sizes = [4, 15, 16], strides = [1, 1, 1]} : vector<4x16x16xf32> to vector<4x15x16xf32>
    %6 = arith.subf %4, %5 : vector<4x15x16xf32>
    %7 = vector.extract_strided_slice %3 {offsets = [0, 0, 1], sizes = [4, 16, 15], strides = [1, 1, 1]} : vector<4x16x16xf32> to vector<4x16x15xf32>
    %8 = vector.extract_strided_slice %3 {offsets = [0, 0, 0], sizes = [4, 16, 15], strides = [1, 1, 1]} : vector<4x16x16xf32> to vector<4x16x15xf32>
    %9 = arith.subf %7, %8 : vector<4x16x15xf32>
    %c0_3 = arith.constant 0 : index
    %c0_4 = arith.constant 0 : index
    %c0_5 = arith.constant 0 : index
    %10 = vector.load %arg3[%c0_3, %c0_4, %c0_5] : memref<1x15x16xf32, #tpu.memory_space<vmem>>, vector<1x15x16xf32>
    %11 = arith.mulf %6, %6 : vector<4x15x16xf32>
    %cst = arith.constant dense<0.000000e+00> : vector<15x16xf32>
    %12 = vector.multi_reduction <add>, %11, %cst [0] : vector<4x15x16xf32> to vector<15x16xf32>
    %13 = vector.shape_cast %12 : vector<15x16xf32> to vector<1x15x16xf32>
    %14 = arith.addf %10, %13 : vector<1x15x16xf32>
    %c0_6 = arith.constant 0 : index
    %c0_7 = arith.constant 0 : index
    %c0_8 = arith.constant 0 : index
    %15 = vector.load %arg3[%c0_6, %c0_7, %c0_8] : memref<1x15x16xf32, #tpu.memory_space<vmem>>, vector<1x15x16xf32>
    tpu.vector_store %arg3[%c0_6, %c0_7, %c0_8], %14 {strides = array<i32>} : memref<1x15x16xf32, #tpu.memory_space<vmem>>, vector<1x15x16xf32>,
    %c0_9 = arith.constant 0 : index
    %c0_10 = arith.constant 0 : index
    %c0_11 = arith.constant 0 : index
    %16 = vector.load %arg4[%c0_9, %c0_10, %c0_11] : memref<1x16x15xf32, #tpu.memory_space<vmem>>, vector<1x16x15xf32>
    %17 = arith.mulf %9, %9 : vector<4x16x15xf32>
    %cst_12 = arith.constant dense<0.000000e+00> : vector<16x15xf32>
    %18 = vector.multi_reduction <add>, %17, %cst_12 [0] : vector<4x16x15xf32> to vector<16x15xf32>
    %19 = vector.shape_cast %18 : vector<16x15xf32> to vector<1x16x15xf32>
    %20 = arith.addf %16, %19 : vector<1x16x15xf32>
    %c0_13 = arith.constant 0 : index
    %c0_14 = arith.constant 0 : index
    %c0_15 = arith.constant 0 : index
    %21 = vector.load %arg4[%c0_13, %c0_14, %c0_15] : memref<1x16x15xf32, #tpu.memory_space<vmem>>, vector<1x16x15xf32>
    tpu.vector_store %arg4[%c0_13, %c0_14, %c0_15], %20 {strides = array<i32>} : memref<1x16x15xf32, #tpu.memory_space<vmem>>, vector<1x16x15xf32>,
    return
  }
  func.func @transform_0(%arg0: i32, %arg1: i32) -> (i32, i32, i32) {
    %c1_i32 = arith.constant 1 : i32
    %0 = arith.muli %arg0, %c1_i32 : i32
    %1 = arith.addi %0, %arg1 : i32
    %c0_i32 = arith.constant 0 : i32
    %c0_i32_0 = arith.constant 0 : i32
    %c0_i32_1 = arith.constant 0 : i32
    return %1, %c0_i32, %c0_i32_0 : i32, i32, i32
  }
  func.func @transform_1(%arg0: i32, %arg1: i32) -> (i32, i32, i32) {
    %c0_i32 = arith.constant 0 : i32
    %c0_i32_0 = arith.constant 0 : i32
    %c0_i32_1 = arith.constant 0 : i32
    return %arg0, %c0_i32, %c0_i32_0 : i32, i32, i32
  }
  func.func @transform_2(%arg0: i32, %arg1: i32) -> (i32, i32, i32) {
    %c0_i32 = arith.constant 0 : i32
    %c0_i32_0 = arith.constant 0 : i32
    %c0_i32_1 = arith.constant 0 : i32
    return %arg0, %c0_i32, %c0_i32_0 : i32, i32, i32
  }
}

</mosaic_0001>

<bundles_post_ra>
// kernel: tpu_custom_call.1
= control target key start
LH: loop header
LB: loop body
LE: loop exit
PB: predicated region body
PF: predicated region fallthrough
CT: control target
= control target key end

     0   :  { %8 = vsyncpa [#allocation3], 0  ;;  %s871_s0 = inlined_call_operand.hbm [shape: f32[8,16,16], index: 0, kind: input, shape index: {}]   ;;  %s872_s1 = inlined_call_operand.vmem [shape: f32[2,15,16], index: 1, kind: output, shape index: {0}]   ;;  %s873_s2 = inlined_call_operand.vmem [shape: f32[2,16,15], index: 2, kind: output, shape index: {1}]  }
   0x1   :  { %10 = vsyncpa [#allocation3 + $0x1], 0  ;;  %s652_s9 = smov 0   ;;  %s654_s10 = smov 0  }
   0x2   :  { %s656_s11 = smov 0   ;;  %s658_s12 = smov 0  }
   0x3   :  { %s660_s13 = smov 0   ;;  %s662_s14 = smov 0  }
   0x4 LB: > { %s469_s15 = sadd.s32 4294967295, %s629_s14   ;;  %s28_s16 = sadd.s32 1, %s625_s13  ;;  %s629_s14 = sphi %s662_s14, %s16_s14   ;;  %s625_s13 = sphi %s660_s13, %s881_s13   ;;  %s621_s12 = sphi %s658_s12, %s880_s12   ;;  %s617_s11 = sphi %s656_s11, %s879_s11   ;;  %s613_s10 = sphi %s654_s10, %s878_s10   ;;  %s609_s9 = sphi %s652_s9, %s877_s9  }
   0x5   : > { %p30_p0 = scmp.ge.s32.totalorder %s28_s16, 2  ;;  %s37_s17 = sadd.s32 1, %s617_s11 }
   0x6   : > { %p44_p1 = scmp.ne.s32.totalorder %s617_s11, %s613_s10  ;;  %p45_p2 = scmp.eq.s32.totalorder %s629_s14, 0 }
   0x7   : > { %s883_s16 = smov (%p30_p0, %s28_s16), 0  ;;  %p50_p4 = scmp.ne.s32.totalorder %s613_s10, %s609_s9 }
   0x8   : > { %p688_p3 = por %p45_p2, %p44_p1  ;;  %s34_s19 = ssub.s32 %s625_s13, %s883_s16 }
   0x9   : > { %p51_p5 = scmp.eq.s32.totalorder %s469_s15, 0  ;;  %p35_p6 = scmp.eq.s32.totalorder %s34_s19, 0 }
   0xa   : > { %p495_p8 = scmp.lt.s32.totalorder %s629_s14, 2  ;;  %s126_s22 = sand.u32 1, %s617_s11  }
   0xb   : > { %p695_p7 = por %p51_p5, %p50_p4  ;;  %s486_s23 = sshll.u32 %s625_s13, 10 }
   0xc   : > { %s701_s21 = scalar_select %p35_p6, %s617_s11, %s37_s17  }
   0xd   : > { %s473_s24 = sshll.u32 %s126_s22, 6  ;;  %s708_s27 = scalar_lea.hbm %s871_s0, %s486_s23 }
   0xe   : > { %s130_s28 = scalar_lea.vmem [#allocation2], %s473_s24  ;;  %p712_p9 = pnand %p495_p8, %p688_p3 }
   0xf   : > { %s139_s29 = sshll.u32 %s130_s28, 4  ;;  %s718_s3 = scalar_lea.sflag [#allocation3], %s126_s22  ;;  %s716_s29 = int_to_ptr.vmem [resolvable:$true] %s139_s29 }
  0x10   : > { %s549_s4 = scalar_lea.hbm %s708_s27, 1024  ;;  %p551_p11 = pneg %p712_p9 }
  0x11   : > { %p550_p10 = scmp.ne.s32.totalorder %s708_s27, %s549_s4  ;;  %s554_s7 = scalar_lea.hbm %s871_s0, 2048 }
  0x12   : > { %p555_p0 = scmp.lt.u32.totalorder %s708_s27, %s871_s0  ;;  %p556_p1 = scmp.lt.u32.totalorder %s554_s7, %s549_s4 }
  0x13   : > { %p552_p12 = pnand %p551_p11, %p550_p10  ;;  %p558_p3 = scmp.lt.u32.totalorder %s549_s4, %s708_s27 }
  0x14   : > { %p557_p2 = por %p556_p1, %p555_p0 }
  0x15   : > { %p553_p13 = pneg %p552_p12 }
  0x16   : > { %p559_p4 = por %p558_p3, %p557_p2 }
  0x18   : > { %p560_p5 = pnand %p559_p4, %p553_p13 }
  0x1a   : > { %563 = shalt.err (!%p560_p5)
}
  0x1b   : > { %s564_s15 = scalar_lea.vmem %s716_s29, 1024  ;;  %s631_s17 = smov [#allocation2]  }
  0x1c   : > { %p565_p6 = scmp.ne.s32.totalorder %s716_s29, %s564_s15  ;;  %s569_s18 = sshll.u32 %s631_s17, 4  ;;  %s570_s18 = int_to_ptr.vmem [resolvable:$false] %s569_s18 }
  0x1d   : > { %s571_s19 = scalar_lea.vmem %s570_s18, 2048  ;;  %p572_p12 = scmp.lt.s32.totalorder %s716_s29, %s570_s18 }
  0x1e   : > { %p567_p8 = pnand %p565_p6, %p551_p11  ;;  %p573_p0 = scmp.lt.s32.totalorder %s571_s19, %s564_s15 }
  0x20   : > { %p568_p10 = pneg %p567_p8  ;;  %p574_p1 = por %p573_p0, %p572_p12 }
  0x22   : > { %p575_p2 = pnand %p574_p1, %p568_p10 }
  0x24   : > { %578 = shalt.err (!%p575_p2)
}
  0x25   : > { %s632_s22 = smov 128   ;;  %s633_s23 = smov 8  }
  0x26   : > { %494 = dma.hbm_to_vmem [thread:$0]  (!%p712_p9), %s708_s27, 1024, %s716_s29, %s718_s3, %s632_s22, %s632_s22, %s633_s23  }
  0x27   : > { %p477_p11 = scmp.ge.s32.totalorder %s629_s14, 1  ;;  %p147_p13 = scmp.lt.s32.totalorder %s629_s14, 3 }
  0x29   : > { %p148_p3 = pnand %p477_p11, %p147_p13 }
  0x2a   : > { %s153_s24 = sand.u32 (!%p148_p3), 1, %s613_s10  }
  0x2b   : > { %151 = sbr.rel (%p148_p3) target bundleno = 304 (0x130), region = 24  ;;  %s478_s25 = sshll.u32 (!%p148_p3), %s153_s24, 6 }
  0x2c   : > { %s154_s26 = scalar_lea.sflag (!%p148_p3), [#allocation3], %s153_s24  ;;  %s157_s28 = scalar_lea.vmem (!%p148_p3), [#allocation2], %s478_s25 }
  0x32   : > { %604 = dma.done.wait (%p695_p7), %s154_s26, 1024  }
  0x33   : > { %606 = vsyncadd (%p695_p7), %s154_s26, 4294966272  ;;  %v753_v0 = vld [vmem:[%s157_s28 + $0x10] sm:$0xff]  ;;  %v755_v1 = vld [vmem:[%s157_s28] sm:$0xff]  ;;  %s634_s27 = smov 1   ;;  %p185_p7 = scmp.lt.s32.totalorder %s621_s12, 1  ;;  %vm201_vm0 = vcmask 129024  }
  0x34   : > { %255 = vrot.lane.b32.xlu1 %v753_v0, %s634_s27  ;;  %251 = vrot.lane.b32.xlu0 %v755_v1, %s634_s27  ;;  %v759_v2 = vld [vmem:[%s157_s28 + $0x18] sm:$0xff]  ;;  %v761_v3 = vld [vmem:[%s157_s28 + $0x8] sm:$0xff]  ;;  %vm203_vm1 = vcmask 121856   ;;  %vm199_vm2 = vcmask 130048   ;;  %v635_v8 = vmov 0.0   ;;  %v226_v9 = vrot.slane %v753_v0, 7 }
  0x35   : > { %v765_v4 = vld [vmem:[%s157_s28 + $0x28] sm:$0xff]  ;;  %v767_v5 = vld [vmem:[%s157_s28 + $0x20] sm:$0xff]  ;;  %s885_s12 = smov (!%p185_p7, %s621_s12), 1  ;;  %v773_v6 = vld [vmem:[%s157_s28 + $0x38] sm:$0xff]  ;;  %v227_v10 = vrot.slane %v759_v2, 7  ;;  %v223_v11 = vrot.slane %v755_v1, 7 }
  0x36   : > { %v775_v7 = vld [vmem:[%s157_s28 + $0x30] sm:$0xff]  ;;  %s487_s20 = sshll.u32 %s885_s12, 4  ;;  %vm222_vm3 = vcmask 1040384   ;;  %v224_v12 = vrot.slane %v761_v3, 7  ;;  %v230_v15 = vrot.slane %v765_v4, 7  ;;  %v229_v16 = vrot.slane %v767_v5, 7 }
  0x37   : > { %s780_s3 = scalar_lea.vmem %s872_s1, %s487_s20  ;;  %s785_s6 = scalar_lea.vmem %s873_s2, %s487_s20  ;;  %v228_v13 = vsel %vm222_vm3, %v226_v9, %v227_v10  ;;  %v245_v17 = vsub.f32 %v753_v0, %v226_v9  ;;  %v243_v18 = vsub.f32 %v755_v1, %v223_v11  ;;  %v233_v22 = vrot.slane %v773_v6, 7 }
  0x38   : > { %257 = vrot.lane.b32.xlu1 %v759_v2, %s634_s27  ;;  %253 = vrot.lane.b32.xlu0 %v761_v3, %s634_s27  ;;  %200 = vst.msk [vmem:[%s780_s3] sm:$0xff] %vm199_vm2, %v635_v8  ;;  %v225_v14 = vsel %vm222_vm3, %v223_v11, %v224_v12  ;;  %v246_v19 = vsub.f32 %v759_v2, %v228_v13  ;;  %v232_v23 = vrot.slane %v775_v7, 7  ;;  %vm293_vm4 = vcmask 130049   ;;  %s636_s12 = smov 127  }
  0x39   : > { %202 = vst.msk [vmem:[%s780_s3 + $0x8] sm:$0x7f] %vm201_vm0, %v635_v8  ;;  %v244_v20 = vsub.f32 %v761_v3, %v225_v14  ;;  %v231_v21 = vsel %vm222_vm3, %v229_v16, %v230_v15  ;;  %v287_v24 = vmul.f32 %v245_v17, %v245_v17  ;;  %v285_v25 = vmul.f32 %v243_v18, %v243_v18 }
  0x3a   : > { %205 = vst.msk [vmem:[%s785_s6 + $0x8] sm:$0xff] %vm203_vm1, %v635_v8  ;;  %204 = vst.msk [vmem:[%s785_s6] sm:$0xff] %vm203_vm1, %v635_v8  ;;  %v288_v26 = vmul.f32 %v246_v19, %v246_v19  ;;  %v247_v27 = vsub.f32 %v767_v5, %v229_v16  ;;  %v248_v29 = vsub.f32 %v765_v4, %v231_v21  ;;  %vm311_vm5 = vcmask 1046528  }
  0x3b   : > { %v286_v28 = vmul.f32 %v244_v20, %v244_v20  ;;  %v234_v30 = vsel %vm222_vm3, %v232_v23, %v233_v22  ;;  %v295_v31 = vsel %vm293_vm4, %v287_v24, 0.0  ;;  %v294_v32 = vsel %vm293_vm4, %v285_v25, 0.0 }
  0x3c   : > { %261 = vrot.lane.b32.xlu1 %v765_v4, %s634_s27  ;;  %259 = vrot.lane.b32.xlu0 %v767_v5, %s634_s27  ;;  %v303_v33 = vsel %vm199_vm2, %v288_v26, 0.0  ;;  %v289_v34 = vmul.f32 %v247_v27, %v247_v27  ;;  %v290_v36 = vmul.f32 %v248_v29, %v248_v29  ;;  %v249_v37 = vsub.f32 %v775_v7, %v232_v23 }
  0x3d   : > { %v302_v35 = vsel %vm199_vm2, %v286_v28, 0.0  ;;  %v250_v38 = vsub.f32 %v773_v6, %v234_v30  ;;  %v296_v39 = vadd.f32 %v295_v31, %v294_v32  ;;  %vm332_vm6 = vcmask 130056  }
  0x3e   : > { %v304_v40 = vadd.f32 %v303_v33, %v302_v35  ;;  %v297_v41 = vsel %vm293_vm4, %v289_v34, 0.0  ;;  %v305_v42 = vsel %vm199_vm2, %v290_v36, 0.0  ;;  %v291_v43 = vmul.f32 %v249_v37, %v249_v37 }
  0x3f   : > { %v292_v44 = vmul.f32 %v250_v38, %v250_v38  ;;  %v298_v45 = vadd.f32 %v297_v41, %v296_v39  ;;  %v283_v8 = vld [vmem:[%s780_s3] sm:$0xff] }
  0x40   : > { %265 = vrot.lane.b32.xlu1 %v773_v6, %s634_s27  ;;  %263 = vrot.lane.b32.xlu0 %v775_v7, %s634_s27  ;;  %v306_v46 = vadd.f32 %v305_v42, %v304_v40  ;;  %v299_v47 = vsel %vm293_vm4, %v291_v43, 0.0  ;;  %v284_v9 = vld [vmem:[%s780_s3 + $0x8] sm:$0x7f] }
  0x41   : > { %v307_v48 = vsel %vm199_vm2, %v292_v44, 0.0  ;;  %v300_v49 = vadd.f32 %v299_v47, %v298_v45  ;;  %v322_v34 = vld [vmem:[%s785_s6] sm:$0xff] }
  0x42   : > { %v308_v50 = vadd.f32 %v307_v48, %v306_v46 }
  0x43   : > { %v312_v51 = vrot.slane %v300_v49, 1 }
  0x44   : > { %v313_v52 = vrot.slane %v308_v50, 1 }
  0x46   : > { %v314_v57 = vsel %vm311_vm5, %v312_v51, %v313_v52 }
  0x47   : > { %v317_v12 = vadd.f32 %v314_v57, %v283_v8 }
  0x49   : > { %319 = vst.msk [vmem:[%s780_s3] sm:$0xff] %vm199_vm2, %v317_v12 }
  0xa6   : > { %v256_v53 = vpop.permute.xlu1 %255  ;;  %v252_v54 = vpop.permute.xlu0 %251 }
  0xa7   : > { %v277_v55 = vsub.f32 %v753_v0, %v256_v53  ;;  %v275_v56 = vsub.f32 %v755_v1, %v252_v54  ;;  %v318_v0 = vadd.f32 %v313_v52, %v284_v9 }
  0xa9   : > { %v326_v62 = vmul.f32 %v277_v55, %v277_v55  ;;  %v324_v63 = vmul.f32 %v275_v56, %v275_v56  ;;  %321 = vst.msk [vmem:[%s780_s3 + $0x8] sm:$0x7f] %vm201_vm0, %v318_v0 }
  0xaa   : > { %v258_v58 = vpop.permute.xlu1 %257  ;;  %v254_v59 = vpop.permute.xlu0 %253 }
  0xab   : > { %v278_v60 = vsub.f32 %v759_v2, %v258_v58  ;;  %v276_v61 = vsub.f32 %v761_v3, %v254_v59  ;;  %v334_v2 = vsel %vm332_vm6, %v326_v62, 0.0  ;;  %v333_v3 = vsel %vm332_vm6, %v324_v63, 0.0 }
  0xac   : > { %v335_v24 = vadd.f32 %v334_v2, %v333_v3 }
  0xad   : > { %v327_v10 = vmul.f32 %v278_v60, %v278_v60  ;;  %v325_v11 = vmul.f32 %v276_v61, %v276_v61 }
  0xae   : > { %v262_v13 = vpop.permute.xlu1 %261  ;;  %v260_v1 = vpop.permute.xlu0 %259 }
  0xaf   : > { %v280_v14 = vsub.f32 %v765_v4, %v262_v13  ;;  %v279_v15 = vsub.f32 %v767_v5, %v260_v1  ;;  %v341_v16 = vsel %vm332_vm6, %v327_v10, 0.0  ;;  %v340_v17 = vsel %vm332_vm6, %v325_v11, 0.0 }
  0xb0   : > { %v342_v25 = vadd.f32 %v341_v16, %v340_v17 }
  0xb1   : > { %v329_v18 = vmul.f32 %v280_v14, %v280_v14  ;;  %v328_v19 = vmul.f32 %v279_v15, %v279_v15 }
  0xb2   : > { %v266_v20 = vpop.permute.xlu1 %265  ;;  %v264_v21 = vpop.permute.xlu0 %263 }
  0xb3   : > { %v343_v4 = vsel %vm332_vm6, %v329_v18, 0.0  ;;  %v336_v5 = vsel %vm332_vm6, %v328_v19, 0.0  ;;  %v282_v22 = vsub.f32 %v773_v6, %v266_v20  ;;  %v281_v23 = vsub.f32 %v775_v7, %v264_v21  ;;  %v323_v6 = vld [vmem:[%s785_s6 + $0x8] sm:$0xff] }
  0xb4   : > { %v344_v28 = vadd.f32 %v343_v4, %v342_v25  ;;  %v337_v29 = vadd.f32 %v336_v5, %v335_v24 }
  0xb5   : > { %v331_v26 = vmul.f32 %v282_v22, %v282_v22  ;;  %v330_v27 = vmul.f32 %v281_v23, %v281_v23 }
  0xb7   : > { %v345_v30 = vsel %vm332_vm6, %v331_v26, 0.0  ;;  %v338_v31 = vsel %vm332_vm6, %v330_v27, 0.0 }
  0xb8   : > { %v346_v32 = vadd.f32 %v345_v30, %v344_v28  ;;  %v339_v33 = vadd.f32 %v338_v31, %v337_v29 }
  0xba   : > { %351 = vrot.lane.b32.xlu1 %v346_v32, %s636_s12  ;;  %349 = vrot.lane.b32.xlu0 %v339_v33, %s636_s12 }
 0x12c   : > { %v352_v7 = vpop.permute.xlu1 %351  ;;  %v350_v35 = vpop.permute.xlu0 %349 }
 0x12d   : > { %v356_v36 = vadd.f32 %v352_v7, %v323_v6  ;;  %v355_v37 = vadd.f32 %v350_v35, %v322_v34 }
 0x12f   : > { %359 = vst.msk [vmem:[%s785_s6 + $0x8] sm:$0xff] %vm203_vm1, %v356_v36  ;;  %358 = vst.msk [vmem:[%s785_s6] sm:$0xff] %vm203_vm1, %v355_v37 }
 0x130 PF: > { %s16_s14 = sadd.s32 1, %s629_s14   ;;  %s877_s9 = smov %s613_s10 }
 0x131   : > { %p13_p9 = scmp.ge.s32.totalorder %s16_s14, 4   ;;  %s878_s10 = smov %s617_s11 }
 0x132   : > { %s879_s11 = smov %s701_s21  ;;  %s880_s12 = smov %s625_s13 }
 0x133   : > { %s881_s13 = smov %s883_s16  ;;  %15 = sbr.rel (!%p13_p9) target bundleno = 4 (0x4), region = 80 }
 0x13a   :  { %397 = vsyncpa [#allocation3], 1 }
 0x13b   :  { %399 = vsyncpa [#allocation3 + $0x1], 1 }

</bundles_post_ra>
